<compile_context>
chip_gen: v6e
topology: v6e:2x2x1
jax: 0.10.0
libtpu: 0.0.40
codegen_flags: <defaults>
</compile_context>

<pallas_src>
import functools

import jax
import jax.numpy as jnp
from jax.experimental import pallas as pl
from jax.experimental.pallas import tpu as pltpu

K_SIZE = 3  # eca_layer default kernel size


# ----------------------------------------------------------------------------
# Hardware-generation-aware budgets.
# ----------------------------------------------------------------------------
def _hw_budgets():
    """Returns (target_block_bytes, max_fused_row_bytes, vmem_limit_bytes)."""
    cap = None
    try:
        cap = getattr(pltpu.get_tpu_info(), "vmem_capacity_bytes", None)
    except Exception:
        cap = None
    if cap is not None and cap >= 96 * 1024 * 1024:
        # v5e / v6e: 128 MiB VMEM per TensorCore -> keep big rows fused.
        return 4 << 20, 16 << 20, 100 << 20
    # v7x (64 MiB VMEM) or unknown generation: conservative.
    return 2 << 20, 4 << 20, 40 << 20


# ----------------------------------------------------------------------------
# In-kernel helpers.
# ----------------------------------------------------------------------------
def _pooled_sum_f32(x):
    """Sum over the last axis, accumulated in float32.

    For sub-32-bit inputs the reduce is chunked over lanes so no full-block
    float32 copy of x is ever materialized.
    """
    hw = x.shape[-1]
    if x.dtype == jnp.float32:
        return jnp.sum(x, axis=-1)
    ch = 2048
    n = -(-hw // ch)
    if n > 16:  # bound the unrolled chunk count
        ch = ((-(-hw // 16) + 127) // 128) * 128
        n = -(-hw // ch)
    s = jnp.zeros(x.shape[:-1], jnp.float32)
    for t in range(n):
        lo = t * ch
        hi = min(lo + ch, hw)
        s = s + jnp.sum(x[..., lo:hi], axis=-1, dtype=jnp.float32)
    return s


def _channel_conv1d(y, w_ref, k_size):
    """PyTorch Conv1d(1,1,k, padding=(k-1)//2, bias=False) along channels.

    y: (rows, C) float32 gate -- tiny compared with the (rows, C, HW) data
    block, so zero-pad via concat + static slices is in the noise.
    """
    rows, c = y.shape
    half = (k_size - 1) // 2
    if half > 0:
        zpad = jnp.zeros((rows, half), dtype=y.dtype)
        yp = jnp.concatenate([zpad, y, zpad], axis=-1)   # (rows, C + k - 1)
    else:
        yp = y
    out = w_ref[0] * yp[:, 0:c]
    for j in range(1, k_size):                           # k is tiny & static
        out = out + w_ref[j] * yp[:, j:j + c]
    return out


def _sigmoid(x):
    # Explicit EUP-friendly formula (avoids relying on lax.logistic lowering).
    return 1.0 / (1.0 + jnp.exp(-x))


# ----------------------------------------------------------------------------
# Fused single-pass kernel: read x once, pool + gate + multiply, write once.
# ----------------------------------------------------------------------------
def _eca_fused_kernel(w_ref, x_ref, o_ref, *, k_size, hw):
    # w_ref: SMEM (k,) f32 conv weights; x_ref/o_ref: VMEM (bt, C, HW).
    x = x_ref[...]
    y = _pooled_sum_f32(x) * (1.0 / hw)                   # (bt, C) f32 mean
    conv = _channel_conv1d(y, w_ref, k_size)              # (bt, C) f32
    gate = _sigmoid(conv).astype(x.dtype)                 # tiny cast
    o_ref[...] = x * gate[:, :, None]


def _eca_fused(x3, wvec, k_size, row_bytes, target_bytes, vmem_limit,
               batch_tile=None):
    b, c, hw = x3.shape
    if batch_tile is not None:
        bt = max(1, min(int(batch_tile), b))
    else:
        # Blocks ~target_bytes, but prefer >=4 grid steps (>=2 per v7x core)
        # for pipeline overlap -- without shrinking blocks below ~1 MiB.
        bt0 = max(1, min(target_bytes // max(row_bytes, 1), b))
        if b >= 4:
            cap_rows = max(1, b // 4)
        elif b >= 2:
            cap_rows = max(1, b // 2)
        else:
            cap_rows = 1
        min_rows = max(1, pl.cdiv(1 << 20, max(row_bytes, 1)))
        bt = max(min(bt0, cap_rows), min(bt0, min_rows))
    grid = (pl.cdiv(b, bt),)

    kernel = functools.partial(_eca_fused_kernel, k_size=k_size, hw=hw)
    return pl.pallas_call(
        kernel,
        out_shape=jax.ShapeDtypeStruct((b, c, hw), x3.dtype),
        grid=grid,
        in_specs=[
            pl.BlockSpec(memory_space=pltpu.MemorySpace.SMEM),   # conv weights
            pl.BlockSpec((bt, c, hw), lambda i: (i, 0, 0)),
        ],
        out_specs=pl.BlockSpec((bt, c, hw), lambda i: (i, 0, 0)),
        compiler_params=pltpu.CompilerParams(
            dimension_semantics=("parallel",),
            vmem_limit_bytes=vmem_limit),
    )(wvec, x3)


# ----------------------------------------------------------------------------
# Two-pass fallback for large C*HW per batch row.
#   Pass 1: fully-parallel per-tile partial sums (f32)   -> (B*n_hw, 1, C)
#   Pass 2: combine partials, conv+sigmoid, broadcast-multiply, lane-dense out.
# ----------------------------------------------------------------------------
def _eca_partial_sum_kernel(x_ref, ps_ref, *, hw_total, thw):
    rem = hw_total % thw                                  # static
    if rem == 0:
        s = _pooled_sum_f32(x_ref[...])                   # (1, C) f32
        ps_ref[...] = s.reshape(1, 1, s.shape[-1])
    else:
        j = pl.program_id(1)
        last = pl.num_programs(1) - 1

        @pl.when(j < last)
        def _():
            s = _pooled_sum_f32(x_ref[...])
            ps_ref[...] = s.reshape(1, 1, s.shape[-1])

        @pl.when(j == last)
        def _():
            # Ragged last tile: slice to the statically-known valid width
            # (no per-element iota/select masking).
            s = _pooled_sum_f32(x_ref[...][:, :, :rem])
            ps_ref[...] = s.reshape(1, 1, s.shape[-1])


def _eca_apply_kernel(w_ref, ps_ref, x_ref, o_ref, *, k_size, hw_total):
    x = x_ref[...]                                        # (1, C, thw)
    n_hw = ps_ref.shape[0]
    c = ps_ref.shape[2]
    ps = ps_ref[...].reshape(n_hw, c)                     # tiny f32 partials
    y = jnp.sum(ps, axis=0, keepdims=True) * (1.0 / hw_total)   # (1, C) mean
    conv = _channel_conv1d(y, w_ref, k_size)
    gate = _sigmoid(conv).astype(x.dtype)
    o_ref[...] = x * gate[:, :, None]


def _choose_spatial_tile(hw, c, itemsize, target_bytes, override=None):
    """Lane-dense spatial tile: multiple of 128, large, dividing hw if possible."""
    if override is not None:
        st = min(int(override), hw)
        if st >= hw:
            return hw
        t = max(128, (st // 128) * 128)
        return hw if t >= hw else t
    max_thw = max(128, (target_bytes // max(c * itemsize, 1)) // 128 * 128)
    if hw <= max_thw:
        return hw
    t = max_thw
    while t >= 128:
        if hw % t == 0:
            return t                                      # no ragged last tile
        t -= 128
    return max_thw                                        # ragged tile handled in kernel


def _eca_two_pass(x3, wvec, k_size, thw, vmem_limit):
    b, c, hw = x3.shape
    n_hw = pl.cdiv(hw, thw)

    psum_kernel = functools.partial(_eca_partial_sum_kernel,
                                    hw_total=hw, thw=thw)
    partial = pl.pallas_call(
        psum_kernel,
        out_shape=jax.ShapeDtypeStruct((b * n_hw, 1, c), jnp.float32),
        grid=(b, n_hw),
        in_specs=[pl.BlockSpec((1, c, thw), lambda i, j: (i, 0, j))],
        out_specs=pl.BlockSpec((1, 1, c),
                               lambda i, j, n=n_hw: (i * n + j, 0, 0)),
        compiler_params=pltpu.CompilerParams(
            dimension_semantics=("parallel", "parallel"),
            vmem_limit_bytes=vmem_limit),
    )(x3)

    apply_kernel = functools.partial(_eca_apply_kernel,
                                     k_size=k_size, hw_total=hw)
    out3 = pl.pallas_call(
        apply_kernel,
        out_shape=jax.ShapeDtypeStruct((b, c, hw), x3.dtype),
        grid=(b, n_hw),
        in_specs=[
            pl.BlockSpec(memory_space=pltpu.MemorySpace.SMEM),    # conv weights
            pl.BlockSpec((n_hw, 1, c), lambda i, j: (i, 0, 0)),   # partial sums
            pl.BlockSpec((1, c, thw), lambda i, j: (i, 0, j)),    # x tile
        ],
        out_specs=pl.BlockSpec((1, c, thw), lambda i, j: (i, 0, j)),
        compiler_params=pltpu.CompilerParams(
            dimension_semantics=("parallel", "parallel"),
            vmem_limit_bytes=vmem_limit),
    )(wvec, partial, x3)
    return out3


# ----------------------------------------------------------------------------
# Public wrapper
# ----------------------------------------------------------------------------
def eca_layer_pallas(x, conv_weight, k_size=K_SIZE, *,
                     max_fused_block_bytes=None, spatial_tile=None,
                     batch_tile=None):
    """x: (B, C, H, W); conv_weight: (k,) or (1,1,k) Conv1d weight (no bias)."""
    if k_size % 2 != 1:
        raise ValueError("eca_layer expects odd k_size (PyTorch padding=(k-1)//2).")
    b, c, h, w = x.shape
    hw = h * w
    x3 = x.reshape(b, c, hw)
    wvec = conv_weight.reshape(-1).astype(jnp.float32)
    assert wvec.shape[0] == k_size

    target, max_fused, vmem_limit = _hw_budgets()
    if max_fused_block_bytes is not None:
        max_fused = max_fused_block_bytes

    row_bytes = c * hw * x.dtype.itemsize
    if row_bytes <= max_fused:
        out3 = _eca_fused(x3, wvec, k_size, row_bytes, target, vmem_limit,
                          batch_tile=batch_tile)
    else:
        thw = _choose_spatial_tile(hw, c, x.dtype.itemsize, target,
                                   override=spatial_tile)
        out3 = _eca_two_pass(x3, wvec, k_size, thw, vmem_limit)
    return out3.reshape(b, c, h, w)


def eca_layer_ref(x, conv_weight, k_size=K_SIZE):
    """Pure-JAX reference mirroring the PyTorch forward (f32 gate math)."""
    b, c, h, w = x.shape
    wvec = conv_weight.reshape(-1).astype(jnp.float32)
    y = jnp.mean(x.astype(jnp.float32), axis=(2, 3))      # (B, C)
    half = (k_size - 1) // 2
    yp = jnp.pad(y, ((0, 0), (half, half)))
    conv = jnp.zeros_like(y)
    for j in range(k_size):
        conv = conv + wvec[j] * yp[:, j:j + c]
    gate = 1.0 / (1.0 + jnp.exp(-conv))
    return x * gate[:, :, None, None]


if __name__ == "__main__":
    key = jax.random.PRNGKey(0)
    kx, kw, kx2, kx3 = jax.random.split(key, 4)

    # Conv1d(1, 1, k, bias=False) weight: (1,1,k) -> (k,), PyTorch-like init.
    bound = 1.0 / jnp.sqrt(jnp.float32(K_SIZE))
    conv_w = jax.random.uniform(kw, (K_SIZE,), dtype=jnp.float32,
                                minval=-bound, maxval=bound)

    # 1) Fused single-pass path (the common case), f32 NCHW input.
    x = jax.random.normal(kx, (2, 4, 16, 16), dtype=jnp.float32)
    out = jax.block_until_ready(eca_layer_pallas(x, conv_w))
    ref = eca_layer_ref(x, conv_w)
    assert out.shape == x.shape and out.dtype == x.dtype
    assert jnp.allclose(out, ref, atol=1e-5, rtol=1e-5), "fused f32 mismatch"

    # 2) Fused path where the batch tile does not divide B (partial block).
    x3b = jax.random.normal(kx3, (3, 4, 16, 16), dtype=jnp.float32)
    out3b = jax.block_until_ready(eca_layer_pallas(x3b, conv_w, batch_tile=2))
    assert jnp.allclose(out3b, eca_layer_ref(x3b, conv_w),
                        atol=1e-5, rtol=1e-5), "fused partial-batch mismatch"

    # 3) Fused path, bf16 input (chunked f32 pooling, bf16 gate multiply).
    xb = x.astype(jnp.bfloat16)
    outb = jax.block_until_ready(eca_layer_pallas(xb, conv_w))
    refb = eca_layer_ref(xb, conv_w)
    assert outb.dtype == jnp.bfloat16
    assert jnp.allclose(outb.astype(jnp.float32), refb.astype(jnp.float32),
                        atol=3e-2, rtol=3e-2), "fused bf16 mismatch"

    # 4) Two-pass fallback forced, single full-width spatial tile (thw == hw).
    x2 = jax.random.normal(kx2, (2, 4, 20, 20), dtype=jnp.float32)
    ref2 = eca_layer_ref(x2, conv_w)
    out2 = jax.block_until_ready(
        eca_layer_pallas(x2, conv_w, max_fused_block_bytes=0))
    assert out2.shape == x2.shape and out2.dtype == x2.dtype
    assert jnp.allclose(out2, ref2, atol=1e-5, rtol=1e-5), \
        "two-pass (full tile) mismatch"

    # 5) Two-pass fallback with a ragged last spatial tile (hw=400, thw=128).
    out2r = jax.block_until_ready(
        eca_layer_pallas(x2, conv_w, max_fused_block_bytes=0, spatial_tile=128))
    assert jnp.allclose(out2r, ref2, atol=1e-5, rtol=1e-5), \
        "two-pass (ragged tile) mismatch"

    print("KERNEL_OK")
</pallas_src>

<mosaic_0001>
module attributes {stable_mosaic.version = 11 : i64} {
  func.func @_eca_fused_kernel(%arg0: i32, %arg1: memref<3xf32, #tpu.memory_space<smem>>, %arg2: memref<2x4x256xf32, #tpu.memory_space<vmem>>, %arg3: memref<2x4x256xf32, #tpu.memory_space<vmem>>) attributes {dimension_semantics = [#tpu.dimension_semantics<parallel>], iteration_bounds = array<i64: 1>, scalar_prefetch = 0 : i64, scratch_operands = 0 : i64, tpu.core_type = #tpu.core_type<tc>, window_params = [{transform_indices = @transform_0, window_bounds = array<i64: 3>}, {transform_indices = @transform_1, window_bounds = array<i64: 2, 4, 256>}, {transform_indices = @transform_2, window_bounds = array<i64: 2, 4, 256>}]} {
    %c0 = arith.constant 0 : index
    %c0_0 = arith.constant 0 : index
    %c0_1 = arith.constant 0 : index
    %0 = vector.load %arg2[%c0, %c0_0, %c0_1] : memref<2x4x256xf32, #tpu.memory_space<vmem>>, vector<2x4x256xf32>
    %cst = arith.constant dense<0.000000e+00> : vector<2x4xf32>
    %1 = vector.multi_reduction <add>, %0, %cst [2] : vector<2x4x256xf32> to vector<2x4xf32>
    %cst_2 = arith.constant 3.906250e-03 : f32
    %2 = vector.broadcast %cst_2 : f32 to vector<2x4xf32>
    %3 = arith.mulf %1, %2 : vector<2x4xf32>
    %cst_3 = arith.constant 0.000000e+00 : f32
    %4 = vector.broadcast %cst_3 : f32 to vector<2x1xf32>
    %5 = tpu.concatenate %4, %3, %4 in 1 : vector<2x1xf32>, vector<2x4xf32>, vector<2x1xf32> -> vector<2x6xf32>
    %c0_4 = arith.constant 0 : index
    %6 = memref.load %arg1[%c0_4] : memref<3xf32, #tpu.memory_space<smem>>
    %7 = vector.extract_strided_slice %5 {offsets = [0, 0], sizes = [2, 4], strides = [1, 1]} : vector<2x6xf32> to vector<2x4xf32>
    %8 = vector.broadcast %6 : f32 to vector<2x4xf32>
    %9 = arith.mulf %8, %7 : vector<2x4xf32>
    %c1 = arith.constant 1 : index
    %10 = memref.load %arg1[%c1] : memref<3xf32, #tpu.memory_space<smem>>
    %11 = vector.extract_strided_slice %5 {offsets = [0, 1], sizes = [2, 4], strides = [1, 1]} : vector<2x6xf32> to vector<2x4xf32>
    %12 = vector.broadcast %10 : f32 to vector<2x4xf32>
    %13 = arith.mulf %12, %11 : vector<2x4xf32>
    %14 = arith.addf %9, %13 : vector<2x4xf32>
    %c2 = arith.constant 2 : index
    %15 = memref.load %arg1[%c2] : memref<3xf32, #tpu.memory_space<smem>>
    %16 = vector.extract_strided_slice %5 {offsets = [0, 2], sizes = [2, 4], strides = [1, 1]} : vector<2x6xf32> to vector<2x4xf32>
    %17 = vector.broadcast %15 : f32 to vector<2x4xf32>
    %18 = arith.mulf %17, %16 : vector<2x4xf32>
    %19 = arith.addf %14, %18 : vector<2x4xf32>
    %cst_5 = arith.constant 0.000000e+00 : f32
    %20 = vector.broadcast %cst_5 : f32 to vector<2x4xf32>
    %21 = arith.subf %20, %19 : vector<2x4xf32>
    %22 = math.exp %21 : vector<2x4xf32>
    %cst_6 = arith.constant 1.000000e+00 : f32
    %23 = vector.broadcast %cst_6 : f32 to vector<2x4xf32>
    %24 = arith.addf %23, %22 : vector<2x4xf32>
    %cst_7 = arith.constant 1.000000e+00 : f32
    %25 = vector.broadcast %cst_7 : f32 to vector<2x4xf32>
    %26 = arith.divf %25, %24 : vector<2x4xf32>
    %27 = vector.shape_cast %26 : vector<2x4xf32> to vector<2x4x1xf32>
    %28 = vector.broadcast %27 : vector<2x4x1xf32> to vector<2x4x256xf32>
    %29 = arith.mulf %0, %28 : vector<2x4x256xf32>
    %c0_8 = arith.constant 0 : index
    %c0_9 = arith.constant 0 : index
    %c0_10 = arith.constant 0 : index
    %30 = vector.load %arg3[%c0_8, %c0_9, %c0_10] : memref<2x4x256xf32, #tpu.memory_space<vmem>>, vector<2x4x256xf32>
    tpu.vector_store %arg3[%c0_8, %c0_9, %c0_10], %29 {strides = array<i32>} : memref<2x4x256xf32, #tpu.memory_space<vmem>>, vector<2x4x256xf32>,
    return
  }
  func.func @transform_0(%arg0: i32) -> i32 {
    %c0_i32 = arith.constant 0 : i32
    %c0_i32_0 = arith.constant 0 : i32
    return %c0_i32 : i32
  }
  func.func @transform_1(%arg0: i32) -> (i32, i32, i32) {
    %c0_i32 = arith.constant 0 : i32
    %c0_i32_0 = arith.constant 0 : i32
    %c0_i32_1 = arith.constant 0 : i32
    return %arg0, %c0_i32, %c0_i32_0 : i32, i32, i32
  }
  func.func @transform_2(%arg0: i32) -> (i32, i32, i32) {
    %c0_i32 = arith.constant 0 : i32
    %c0_i32_0 = arith.constant 0 : i32
    %c0_i32_1 = arith.constant 0 : i32
    return %arg0, %c0_i32, %c0_i32_0 : i32, i32, i32
  }
}

</mosaic_0001>

<bundles_post_ra>
// kernel: tpu_custom_call.1
= control target key start
LH: loop header
LB: loop body
LE: loop exit
PB: predicated region body
PF: predicated region fallthrough
CT: control target
= control target key end

     0   :  { %7 = vsyncpa [#allocation5], 0  ;;  %s277_s0 = inlined_call_operand.hbm [shape: f32[3], index: 0, kind: input, shape index: {}]   ;;  %s278_s1 = inlined_call_operand.hbm [shape: f32[2,4,256], index: 1, kind: input, shape index: {}]   ;;  %s279_s2 = inlined_call_operand.hbm [shape: f32[2,4,256], index: 2, kind: output, shape index: {}]  }
   0x1   :  { %8 = vsyncpa [#allocation3], 0 }
   0x2   :  { %9 = vsyncpa [#allocation4], 0  ;;  %s227_s9 = smov [#allocation2]   ;;  %s228_s12 = smov [#allocation6]  }
   0x3   :  { %17 = dma.hbm_to_smem %s277_s0, 16, %s227_s9, [#allocation5]  }
   0x4   :  { %s23_s13 = sshll.u32 %s228_s12, 4  ;;  %s24_s13 = int_to_ptr.vmem [resolvable:$true] %s23_s13 }
   0x5   :  { %s189_s14 = scalar_lea.vmem %s24_s13, 256  ;;  %p194_p1 = scmp.lt.s32.totalorder %s24_s13, %s24_s13 }
   0x6   :  { %p190_p0 = scmp.ne.s32.totalorder %s24_s13, %s189_s14  ;;  %p195_p2 = scmp.lt.s32.totalorder %s189_s14, %s189_s14 }
   0x8   :  { %p196_p3 = por %p195_p2, %p194_p1 }
   0xa   :  { %p197_p4 = pnand %p196_p3, %p190_p0 }
   0xc   :  { %200 = shalt.err (!%p197_p4)
}
   0xd   :  { %s229_s15 = smov 128   ;;  %s230_s16 = smov 8  }
   0xe   :  { %29 = dma.hbm_to_vmem [thread:$0]  %s278_s1, 256, %s24_s13, [#allocation3], %s229_s15, %s229_s15, %s230_s16  }
   0xf   :  { %221 = dma.done.wait [#allocation5], 16  }
  0x10   :  { %222 = vsyncadd [#allocation5], 4294967280 }
  0x11   :  { %223 = dma.done.wait [#allocation3], 256  }
  0x12   :  { %224 = vsyncadd [#allocation3], 4294967040 }
  0x13   :  { %36 = sfence }
  0x14   :  { %v259_v0 = vld [vmem:[#allocation6] sm:$0xff]  ;;  %vm45_vm0 = vcmask 1043456   ;;  %v261_v1 = vld [vmem:[#allocation6 + $0x8] sm:$0xff]  ;;  %v60_v10 = vlaneseq  ;;  %s157_s0 = sld [smem:[#allocation2 + $0x1]]  ;;  %vm71_vm1 = vcmask 1041409   ;;  %vm74_vm2 = vcmask 7168  }
  0x15   :  { %v41_v2 = vcombine.high %v259_v0, %v259_v0  ;;  %v46_v3 = vsel %vm45_vm0, %v259_v0, 0.0  ;;  %v42_v4 = vcombine.high %v261_v1, %v261_v1  ;;  %v51_v6 = vsel %vm45_vm0, %v261_v1, 0.0  ;;  %s158_s1 = sld [smem:[#allocation2 + $0x2]]  ;;  %s231_s19 = smov 127  }
  0x16   :  { %v61_v11 = vand.u32 127, %v60_v10  ;;  %v64_v13 = vshrl.u32 %v60_v10, 7  ;;  %vm76_vm3 = vcmask 39936   ;;  %s232_s20 = smov 126   ;;  %s78_s21 = sld [smem:[#allocation2]] }
  0x17   :  { %v47_v5 = vsel %vm45_vm0, %v41_v2, 0.0  ;;  %v52_v7 = vsel %vm45_vm0, %v42_v4, 0.0  ;;  %v233_v43 = vmov 839922192   ;;  %s234_s22 = smov [#allocation7]  }
  0x18   :  { %v48_v8 = vadd.f32 %v47_v5, %v46_v3  ;;  %v53_v9 = vadd.f32 %v52_v7, %v51_v6  ;;  %v62_v12 = vadd.s32 4294967295, %v61_v11  ;;  %v112_v38 = vsub.s32 1, %v64_v13  ;;  %s144_s23 = sshll.u32 %s234_s22, 4  ;;  %s145_s23 = int_to_ptr.vmem [resolvable:$true] %s144_s23 }
  0x19   :  { %v105_v39 = vsub.s32 0, %v64_v13  ;;  %v120_v44 = vunpack.c.l.s4 %v233_v43  ;;  %s201_s24 = scalar_lea.vmem %s145_s23, 256  ;;  %p206_p6 = scmp.lt.s32.totalorder %s145_s23, %s145_s23 }
  0x1a   :  { %49 = vadd.xlane.f32.xlu0 %v48_v8  ;;  %v65_v15 = vsub.s32 %v62_v12, %v64_v13  ;;  %v82_v22 = vstv %s157_s0  ;;  %p202_p5 = scmp.ne.s32.totalorder %s145_s23, %s201_s24  ;;  %p207_p7 = scmp.lt.s32.totalorder %s201_s24, %s201_s24 }
  0x1b   :  { %v90_v26 = vstv %s158_s1  ;;  %v121_v45 = vunpack.c.0.s8 %v120_v44 }
  0x1c   :  { %v79_v28 = vstv %s78_s21  ;;  %p208_p8 = por %p207_p7, %p206_p6 }
  0x1d   :  { %v124_v46 = vsub.s32 %v121_v45, %v64_v13 }
  0x1e   :  { %54 = vadd.xlane.f32.xlu0 %v53_v9  ;;  %p209_p9 = pnand %p208_p8, %p202_p5 }
  0xa3   :  { %v50_v14 = vpop.xlane.xlu0 %49 }
  0xa4   :  { %v56_v16 = vmul.f32 0.00390625, %v50_v14 }
  0xa6   :  { %v66_v19 = vrot.slane %v56_v16, %v65_v15 }
  0xa7   :  { %v55_v17 = vpop.xlane.xlu0 %54 }
  0xa8   :  { %v57_v18 = vmul.f32 0.00390625, %v55_v17 }
  0xaa   :  { %v70_v20 = vrot.slane %v57_v18, %v65_v15 }
  0xac   :  { %v72_v21 = vsel %vm71_vm1, %v70_v20, %v66_v19 }
  0xad   :  { %v75_v23 = vsel %vm74_vm2, 0.0, %v72_v21 }
  0xae   :  { %v77_v24 = vsel %vm76_vm3, %v75_v23, 0.0 }
  0xaf   :  { %v83_v25 = vmul.f32 %v82_v22, %v77_v24  ;;  %v91_v27 = vmul.f32 %v90_v26, %v77_v24  ;;  %v80_v30 = vmul.f32 %v79_v28, %v77_v24 }
  0xb1   :  { %85 = vrot.lane.b32.xlu1 %v83_v25, %s231_s19 }
  0xb5   :  { %93 = vrot.lane.b32.xlu1 %v91_v27, %s232_s20 }
 0x123   :  { %v86_v29 = vpop.permute.xlu1 %85 }
 0x124   :  { %v88_v31 = vadd.f32 %v86_v29, %v80_v30 }
 0x127   :  { %v94_v32 = vpop.permute.xlu1 %93 }
 0x128   :  { %v96_v33 = vadd.f32 %v94_v32, %v88_v31 }
 0x12a   :  { %v97_v34 = vsub.f32 0.0, %v96_v33 }
 0x12c   :  { %v98_v35 = vmul.f32 1.442695, %v97_v34 }
 0x12e   :  { %169 = vpow2.f32 %v98_v35 }
 0x13b   :  { %v170_v36 = vpop.eup %169 }
 0x13c   :  { %v100_v37 = vadd.f32 1.0, %v170_v36 }
 0x13e   :  { %171 = vrcp.f32 %v100_v37 }
 0x14b   :  { %v172_v40 = vpop.eup %171 }
 0x14c   :  { %v113_v41 = vrot.slane %v172_v40, %v112_v38  ;;  %v106_v42 = vrot.slane %v172_v40, %v105_v39 }
 0x14e   :  { %115 = vbcast.lane.b32.xlu1 %v113_v41, 256  ;;  %108 = vbcast.lane.b32.xlu0 %v106_v42, 256 }
 0x1c0   :  { %v116_v47 = vpop.permute.xlu1 %115  ;;  %v109_v48 = vpop.permute.xlu0 %108 }
 0x1c1   :  { %v132_v49 = vrot.slane %v116_v47, %v124_v46  ;;  %v125_v50 = vrot.slane %v109_v48, %v124_v46 }
 0x1c3   :  { %v135_v51 = vmul.f32 %v125_v50, %v259_v0  ;;  %v136_v52 = vmul.f32 %v132_v49, %v261_v1 }
 0x1c5   :  { %137 = vst [vmem:[#allocation7] sm:$0xff] %v135_v51  ;;  %138 = vst [vmem:[#allocation7 + $0x8] sm:$0xff] %v136_v52 }
 0x1c6   :  { %212 = shalt.err (!%p209_p9)
}
 0x1c7   :  { %150 = dma.vmem_to_hbm [thread:$0]  %s145_s23, 256, %s279_s2, [#allocation4], %s229_s15, %s229_s15, %s230_s16  }
 0x1c8   :  { %225 = dma.done.wait [#allocation4], 256  }
 0x1c9   :  { %226 = vsyncadd [#allocation4], 4294967040 }
 0x1ca   :  { %154 = vsyncpa [#allocation3], 1 }
 0x1cb   :  { %155 = vsyncpa [#allocation4], 1 }
 0x1cc   :  { %156 = vsyncpa [#allocation5], 1 }

</bundles_post_ra>
